<compile_context>
chip_gen: v7x
topology: tpu7x:2x2x1
jax: 0.10.0
libtpu: 0.0.40
codegen_flags: <defaults>
</compile_context>

<pallas_src>
import functools

import jax
import jax.numpy as jnp
from jax import lax
from jax.experimental import pallas as pl
from jax.experimental.pallas import tpu as pltpu


def _round_up(x, m):
    return (x + m - 1) // m * m


# ----------------------------- Pallas kernel --------------------------------
def _basic_block_kernel(x_ref, w1_ref, w2_ref, sb_ref, mask_ref, o_ref, *,
                        wp, hw, xcw):
    """Fused BasicBlock on one lane-chunk of one image (channel-first layout).

    x_ref    : (Cin, LX)  zero-padded image raster with a (wp+1)-lane front
                          guard; lane (wp+1 + py*wp + px) = padded pixel (py,px).
                          Resident across the lane-chunk grid axis.
    w1_ref   : (G1, P, K1) conv1 weights grouped for accumulating matmuls
                          (G1=3, K1=3*Cin  or  G1=9, K1=Cin)
    w2_ref   : (G2, P, K2) conv2 weights, same grouping over P input channels
    sb_ref   : (P, 4)     folded BN params [scale1, bias1, scale2, bias2] (f32)
    mask_ref : (1, LM)    1.0 where a (guard-offset) h1 lane is a valid conv1
                          output pixel, else 0.0
    o_ref    : (P, TL)    output chunk; lane i' = output raster lane c0 + i'
                          (row-major with stride wp; host slices off the halo)
    """
    tl = o_ref.shape[-1]
    r = pl.program_id(1)
    c0 = pl.multiple_of(r * tl, 128)          # chunk start, 128-lane aligned

    x_c = x_ref[:, pl.ds(c0, xcw)]            # (Cin, XCW) chunk + both conv halos
    mask = mask_ref[:, pl.ds(c0, hw)]         # (1, HW)    valid-h1-lane mask
    s1, b1 = sb_ref[:, 0:1], sb_ref[:, 1:2]
    s2, b2 = sb_ref[:, 2:3], sb_ref[:, 3:4]

    def conv3x3(w_ref, src, width):
        """3x3 conv as accumulating tap-group matmuls (no im2col buffer).

        out[:, t] = sum_{kh,kw} W[kh,kw] @ src[:, t + kh*wp + kw]
        Each group's (K, width) tap block is consumed immediately by one MXU
        matmul and accumulated in f32.
        """
        ngrp = w_ref.shape[0]
        acc = None
        for g in range(ngrp):
            if ngrp == 9:                     # per-tap groups: K = Cin
                kh, kw = divmod(g, 3)
                blk = src[:, kh * wp + kw: kh * wp + kw + width]
            else:                             # per-kh-row groups: K = 3*Cin
                blk = jnp.concatenate(
                    [src[:, g * wp + kw: g * wp + kw + width] for kw in range(3)],
                    axis=0)
            part = jnp.dot(w_ref[g], blk, preferred_element_type=jnp.float32)
            acc = part if acc is None else acc + part
        return acc

    # conv1 + bn1 + relu on a (TL + halo) window; the mask zeroes padded /
    # out-of-image lanes so they act as conv2's zero border.
    h1 = jnp.maximum(conv3x3(w1_ref, x_c, hw) * s1 + b1, 0.0) * mask
    h1 = h1.astype(x_c.dtype)

    # conv2 + bn2 + residual + relu.  h1 lane t corresponds to output lane
    # c0 + t - (wp+1): the re-padding shift is folded into the tap indexing.
    acc2 = conv3x3(w2_ref, h1, tl)
    identity = x_c[:, 2 * wp + 2: 2 * wp + 2 + tl].astype(jnp.float32)
    o_ref[...] = jnp.maximum(acc2 * s2 + b2 + identity, 0.0).astype(o_ref.dtype)


# ------------------------------ JAX wrapper ----------------------------------
def _fold_bn(gamma, beta, mean, var, eps=1e-5):
    scale = gamma / jnp.sqrt(var + eps)
    bias = beta - mean * scale
    return scale, bias


def _group_weights(w_hwio, ngrp, dtype):
    """(3,3,Cin,P) HWIO -> (ngrp, P, (9//ngrp)*Cin); inner index = kw*Cin + cin."""
    _, _, cin, cout = w_hwio.shape
    w = w_hwio.reshape(ngrp, (9 // ngrp) * cin, cout)
    return jnp.transpose(w, (0, 2, 1)).astype(dtype)


@functools.partial(jax.jit, static_argnames=("compute_dtype", "lane_tile"))
def basic_block(x_nchw, params, compute_dtype=jnp.bfloat16, lane_tile=None):
    """Fused BasicBlock forward.  x_nchw: (N, C, H, W) -> (N, C, H, W)."""
    w1, w2 = params["w1"], params["w2"]        # (3, 3, Cin, P) HWIO
    n, c, h, w = x_nchw.shape
    p = w1.shape[-1]
    assert w1.shape[2] == c and w2.shape == (3, 3, p, p) and c == p, \
        "kernel covers stride=1, downsample=None (in_planes == planes)"
    # TODO(synk): stride != 1 / downsample path and training-mode BatchNorm.

    # Small-planes regime (review item 8): keep f32 end-to-end; else bf16.
    mm_dtype = jnp.dtype(compute_dtype) if c >= 8 else jnp.dtype(jnp.float32)
    mm_size = mm_dtype.itemsize

    wp, hp = w + 2, h + 2
    guard = wp + 1                   # front guard so every halo slice starts at c0
    out_lanes = h * wp               # output raster length (stride wp, halo cols)

    # Lane-chunk tiling (multiple of 128 lanes -> unmasked lane-dense stores).
    if lane_tile is None:
        tl = 512 if out_lanes >= 2048 else (256 if out_lanes >= 512 else 128)
    else:
        tl = lane_tile
    assert tl % 128 == 0
    nc = pl.cdiv(out_lanes, tl)                 # lane chunks per image
    hw_ = _round_up(tl + 2 * wp + 2, 128)       # h1 chunk width (chunk + conv2 halo)
    xcw = _round_up(hw_ + 2 * wp + 2, 128)      # x  chunk width (+ conv1 halo)
    lx = _round_up(max(guard + hp * wp, (nc - 1) * tl + xcw), 128)
    lm = _round_up((nc - 1) * tl + hw_, 128)

    # Zero-padded NCHW image flattened to a guarded per-image (C, LX) raster.
    x_pad = jnp.pad(x_nchw, ((0, 0), (0, 0), (1, 1), (1, 1)))
    x_slab = jnp.pad(x_pad.reshape(n, c, hp * wp),
                     ((0, 0), (0, 0), (guard, lx - guard - hp * wp))).astype(mm_dtype)

    # Weights grouped for accumulating matmuls.
    ngrp = 9 if c >= 128 else 3
    w1g = _group_weights(w1, ngrp, mm_dtype)          # (ngrp, P, (9//ngrp)*C)
    w2g = _group_weights(w2, ngrp, mm_dtype)

    # Folded inference-mode BatchNorm, f32 epilogue.
    s1, b1 = _fold_bn(*params["bn1"])
    s2, b2 = _fold_bn(*params["bn2"])
    sb = jnp.stack([s1, b1, s2, b2], axis=1).astype(jnp.float32)      # (P, 4)

    # Valid conv1-output-lane mask, guard-offset like the x slab:
    # entry (guard + m) is 1.0 iff m = y*wp + x with 0 <= y < H and x < W.
    m_idx = jnp.arange(lm) - guard
    mask = ((m_idx >= 0) & (m_idx < out_lanes)
            & (m_idx % wp < w)).astype(jnp.float32)[None, :]

    # Advisory cost + VMEM limit from actual buffer sizes (not hard-coded).
    flops = n * nc * 2 * (hw_ + tl) * (9 * c) * p
    bytes_accessed = int(x_slab.size * mm_size + w1g.size * mm_size
                         + w2g.size * mm_size + sb.size * 4 + mask.size * 4
                         + n * p * nc * tl * mm_size)
    grid_buffers = 2 * (c * lx * mm_size + w1g.size * mm_size + w2g.size * mm_size
                        + sb.size * 4 + mask.size * 4 + p * tl * mm_size)
    chunk_scratch = (c * xcw * mm_size + 3 * c * hw_ * mm_size
                     + p * hw_ * (8 + mm_size) + p * tl * (8 + mm_size))
    vmem_limit = int(min(100 * 1024 * 1024,
                         max(16 * 1024 * 1024,
                             grid_buffers + chunk_scratch + (8 << 20))))

    kernel = functools.partial(_basic_block_kernel, wp=wp, hw=hw_, xcw=xcw)
    out_ext = pl.pallas_call(
        kernel,
        out_shape=jax.ShapeDtypeStruct((n, p, nc * tl), mm_dtype),
        grid_spec=pltpu.PrefetchScalarGridSpec(
            num_scalar_prefetch=0,
            grid=(n, nc),                       # batch (megacore) x lane chunks
            in_specs=[
                pl.BlockSpec((None, c, lx), lambda i, j: (i, 0, 0)),
                pl.BlockSpec(w1g.shape, lambda i, j: (0, 0, 0)),
                pl.BlockSpec(w2g.shape, lambda i, j: (0, 0, 0)),
                pl.BlockSpec((p, 4), lambda i, j: (0, 0)),
                pl.BlockSpec((1, lm), lambda i, j: (0, 0)),
            ],
            out_specs=pl.BlockSpec((None, p, tl), lambda i, j: (i, 0, j)),
        ),
        compiler_params=pltpu.CompilerParams(
            dimension_semantics=("parallel", "arbitrary"),
            vmem_limit_bytes=vmem_limit),
        cost_estimate=pl.CostEstimate(flops=int(flops), transcendentals=0,
                                      bytes_accessed=bytes_accessed),
    )(x_slab, w1g, w2g, sb, mask)

    # Drop halo lanes: (N, P, NC*TL) -> (N, P, H, W).  Already NCHW.
    out = out_ext[:, :, :out_lanes].reshape(n, p, h, wp)[..., :w]
    return out.astype(x_nchw.dtype)


# ------------------------------ reference ------------------------------------
def _reference(x_nchw, params):
    dn = ("NHWC", "HWIO", "NHWC")
    x = jnp.transpose(x_nchw, (0, 2, 3, 1))
    s1, b1 = _fold_bn(*params["bn1"])
    s2, b2 = _fold_bn(*params["bn2"])
    o = lax.conv_general_dilated(x, params["w1"], (1, 1), "SAME",
                                 dimension_numbers=dn)
    o = jnp.maximum(o * s1 + b1, 0.0)
    o = lax.conv_general_dilated(o, params["w2"], (1, 1), "SAME",
                                 dimension_numbers=dn)
    o = jnp.maximum(o * s2 + b2 + x, 0.0)
    return jnp.transpose(o, (0, 3, 1, 2))


# ------------------------------- main -----------------------------------------
if __name__ == "__main__":
    def make_params(key, c, p):
        ks = jax.random.split(key, 8)
        return {
            "w1": 0.1 * jax.random.normal(ks[0], (3, 3, c, p), jnp.float32),
            "w2": 0.1 * jax.random.normal(ks[1], (3, 3, p, p), jnp.float32),
            # (gamma, beta, running_mean, running_var) — inference-mode BN
            "bn1": (1.0 + 0.1 * jax.random.normal(ks[2], (p,), jnp.float32),
                    0.05 * jax.random.normal(ks[3], (p,), jnp.float32),
                    0.02 * jax.random.normal(ks[4], (p,), jnp.float32),
                    1.0 + 0.1 * jnp.abs(jax.random.normal(ks[5], (p,), jnp.float32))),
            "bn2": (1.0 + 0.1 * jax.random.normal(ks[6], (p,), jnp.float32),
                    0.05 * jax.random.normal(ks[7], (p,), jnp.float32),
                    jnp.zeros((p,), jnp.float32),
                    jnp.ones((p,), jnp.float32)),
        }

    root = jax.random.PRNGKey(0)
    k_x1, k_p1, k_x2, k_p2 = jax.random.split(root, 4)

    # Small-planes config from the module (f32 path, exact identity).
    N, C, H, W = 2, 4, 16, 16
    params = make_params(k_p1, C, C)
    x = jax.random.normal(k_x1, (N, C, H, W), jnp.float32)
    out = jax.block_until_ready(basic_block(x, params))
    ref = _reference(x, params)
    assert out.shape == (N, C, H, W)
    assert jnp.allclose(out, ref, atol=1e-2, rtol=1e-2), "mismatch (f32 path)"

    # Also exercise the bf16 (C >= 8) path: bf16 slab / matmuls / bf16 output.
    N2, C2, H2, W2 = 2, 8, 8, 8
    params2 = make_params(k_p2, C2, C2)
    x2 = jax.random.normal(k_x2, (N2, C2, H2, W2), jnp.float32)
    out2 = jax.block_until_ready(basic_block(x2, params2))
    ref2 = _reference(x2, params2)
    assert out2.shape == (N2, C2, H2, W2)
    assert jnp.allclose(out2, ref2, atol=8e-2, rtol=8e-2), "mismatch (bf16 path)"

    print("KERNEL_OK")
</pallas_src>

<mosaic_0001>
module attributes {stable_mosaic.version = 11 : i64} {
  func.func @_basic_block_kernel(%arg0: i32, %arg1: i32, %arg2: memref<1x4x640xf32, #tpu.memory_space<vmem>>, %arg3: memref<3x4x12xf32, #tpu.memory_space<vmem>>, %arg4: memref<3x4x12xf32, #tpu.memory_space<vmem>>, %arg5: memref<4x4xf32, #tpu.memory_space<vmem>>, %arg6: memref<1x512xf32, #tpu.memory_space<vmem>>, %arg7: memref<1x4x128xf32, #tpu.memory_space<vmem>>) attributes {dimension_semantics = [#tpu.dimension_semantics<parallel>, #tpu.dimension_semantics<arbitrary>], iteration_bounds = array<i64: 2, 3>, scalar_prefetch = 0 : i64, scratch_operands = 0 : i64, tpu.core_type = #tpu.core_type<tc>, window_params = [{transform_indices = @transform_0, window_bounds = array<i64: 1, 4, 640>}, {pipeline_mode = #tpu.pipeline_mode<synchronous>, transform_indices = @transform_1, window_bounds = array<i64: 3, 4, 12>}, {pipeline_mode = #tpu.pipeline_mode<synchronous>, transform_indices = @transform_2, window_bounds = array<i64: 3, 4, 12>}, {pipeline_mode = #tpu.pipeline_mode<synchronous>, transform_indices = @transform_3, window_bounds = array<i64: 4, 4>}, {pipeline_mode = #tpu.pipeline_mode<synchronous>, transform_indices = @transform_4, window_bounds = array<i64: 1, 512>}, {transform_indices = @transform_5, window_bounds = array<i64: 1, 4, 128>}]} {
    %c128_i32 = arith.constant 128 : i32
    %0 = arith.muli %arg1, %c128_i32 : i32
    %1 = tpu.assume_multiple %0, 128 : i32
    %c0 = arith.constant 0 : index
    %c0_0 = arith.constant 0 : index
    %2 = arith.index_cast %1 : i32 to index
    %3 = vector.load %arg2[%c0, %c0_0, %2] : memref<1x4x640xf32, #tpu.memory_space<vmem>>, vector<1x4x384xf32>
    %4 = vector.shape_cast %3 : vector<1x4x384xf32> to vector<4x384xf32>
    %c0_1 = arith.constant 0 : index
    %5 = arith.index_cast %1 : i32 to index
    %6 = vector.load %arg6[%c0_1, %5] : memref<1x512xf32, #tpu.memory_space<vmem>>, vector<1x256xf32>
    %c0_2 = arith.constant 0 : index
    %c0_3 = arith.constant 0 : index
    %7 = vector.load %arg5[%c0_2, %c0_3] : memref<4x4xf32, #tpu.memory_space<vmem>>, vector<4x1xf32>
    %c0_4 = arith.constant 0 : index
    %c1 = arith.constant 1 : index
    %8 = vector.load %arg5[%c0_4, %c1] : memref<4x4xf32, #tpu.memory_space<vmem>>, vector<4x1xf32>
    %c0_5 = arith.constant 0 : index
    %c2 = arith.constant 2 : index
    %9 = vector.load %arg5[%c0_5, %c2] : memref<4x4xf32, #tpu.memory_space<vmem>>, vector<4x1xf32>
    %c0_6 = arith.constant 0 : index
    %c3 = arith.constant 3 : index
    %10 = vector.load %arg5[%c0_6, %c3] : memref<4x4xf32, #tpu.memory_space<vmem>>, vector<4x1xf32>
    %11 = vector.extract_strided_slice %4 {offsets = [0, 0], sizes = [4, 256], strides = [1, 1]} : vector<4x384xf32> to vector<4x256xf32>
    %12 = vector.extract_strided_slice %4 {offsets = [0, 1], sizes = [4, 256], strides = [1, 1]} : vector<4x384xf32> to vector<4x256xf32>
    %13 = vector.extract_strided_slice %4 {offsets = [0, 2], sizes = [4, 256], strides = [1, 1]} : vector<4x384xf32> to vector<4x256xf32>
    %14 = tpu.concatenate %11, %12, %13 in 0 : vector<4x256xf32>, vector<4x256xf32>, vector<4x256xf32> -> vector<12x256xf32>
    %c0_7 = arith.constant 0 : index
    %c0_8 = arith.constant 0 : index
    %c0_9 = arith.constant 0 : index
    %15 = vector.load %arg3[%c0_7, %c0_8, %c0_9] : memref<3x4x12xf32, #tpu.memory_space<vmem>>, vector<1x4x12xf32>
    %16 = vector.shape_cast %15 : vector<1x4x12xf32> to vector<4x12xf32>
    %cst = arith.constant dense<0.000000e+00> : vector<4x256xf32>
    %17 = tpu.matmul %16, %14, %cst {dimension_numbers = #tpu.dot_dimension_numbers<[1], [0], [0], [1], [0, 0, 1, 1], [], []>} : vector<4x12xf32>, vector<12x256xf32>, vector<4x256xf32> -> vector<4x256xf32>
    %18 = vector.extract_strided_slice %4 {offsets = [0, 18], sizes = [4, 256], strides = [1, 1]} : vector<4x384xf32> to vector<4x256xf32>
    %19 = vector.extract_strided_slice %4 {offsets = [0, 19], sizes = [4, 256], strides = [1, 1]} : vector<4x384xf32> to vector<4x256xf32>
    %20 = vector.extract_strided_slice %4 {offsets = [0, 20], sizes = [4, 256], strides = [1, 1]} : vector<4x384xf32> to vector<4x256xf32>
    %21 = tpu.concatenate %18, %19, %20 in 0 : vector<4x256xf32>, vector<4x256xf32>, vector<4x256xf32> -> vector<12x256xf32>
    %c1_10 = arith.constant 1 : index
    %c0_11 = arith.constant 0 : index
    %c0_12 = arith.constant 0 : index
    %22 = vector.load %arg3[%c1_10, %c0_11, %c0_12] : memref<3x4x12xf32, #tpu.memory_space<vmem>>, vector<1x4x12xf32>
    %23 = vector.shape_cast %22 : vector<1x4x12xf32> to vector<4x12xf32>
    %cst_13 = arith.constant dense<0.000000e+00> : vector<4x256xf32>
    %24 = tpu.matmul %23, %21, %cst_13 {dimension_numbers = #tpu.dot_dimension_numbers<[1], [0], [0], [1], [0, 0, 1, 1], [], []>} : vector<4x12xf32>, vector<12x256xf32>, vector<4x256xf32> -> vector<4x256xf32>
    %25 = arith.addf %17, %24 : vector<4x256xf32>
    %26 = vector.extract_strided_slice %4 {offsets = [0, 36], sizes = [4, 256], strides = [1, 1]} : vector<4x384xf32> to vector<4x256xf32>
    %27 = vector.extract_strided_slice %4 {offsets = [0, 37], sizes = [4, 256], strides = [1, 1]} : vector<4x384xf32> to vector<4x256xf32>
    %28 = vector.extract_strided_slice %4 {offsets = [0, 38], sizes = [4, 256], strides = [1, 1]} : vector<4x384xf32> to vector<4x256xf32>
    %29 = tpu.concatenate %26, %27, %28 in 0 : vector<4x256xf32>, vector<4x256xf32>, vector<4x256xf32> -> vector<12x256xf32>
    %c2_14 = arith.constant 2 : index
    %c0_15 = arith.constant 0 : index
    %c0_16 = arith.constant 0 : index
    %30 = vector.load %arg3[%c2_14, %c0_15, %c0_16] : memref<3x4x12xf32, #tpu.memory_space<vmem>>, vector<1x4x12xf32>
    %31 = vector.shape_cast %30 : vector<1x4x12xf32> to vector<4x12xf32>
    %cst_17 = arith.constant dense<0.000000e+00> : vector<4x256xf32>
    %32 = tpu.matmul %31, %29, %cst_17 {dimension_numbers = #tpu.dot_dimension_numbers<[1], [0], [0], [1], [0, 0, 1, 1], [], []>} : vector<4x12xf32>, vector<12x256xf32>, vector<4x256xf32> -> vector<4x256xf32>
    %33 = arith.addf %25, %32 : vector<4x256xf32>
    %34 = vector.broadcast %7 : vector<4x1xf32> to vector<4x256xf32>
    %35 = arith.mulf %33, %34 : vector<4x256xf32>
    %36 = vector.broadcast %8 : vector<4x1xf32> to vector<4x256xf32>
    %37 = arith.addf %35, %36 : vector<4x256xf32>
    %cst_18 = arith.constant 0.000000e+00 : f32
    %38 = vector.broadcast %cst_18 : f32 to vector<4x256xf32>
    %39 = arith.maximumf %37, %38 : vector<4x256xf32>
    %40 = vector.broadcast %6 : vector<1x256xf32> to vector<4x256xf32>
    %41 = arith.mulf %39, %40 : vector<4x256xf32>
    %42 = vector.extract_strided_slice %41 {offsets = [0, 0], sizes = [4, 128], strides = [1, 1]} : vector<4x256xf32> to vector<4x128xf32>
    %43 = vector.extract_strided_slice %41 {offsets = [0, 1], sizes = [4, 128], strides = [1, 1]} : vector<4x256xf32> to vector<4x128xf32>
    %44 = vector.extract_strided_slice %41 {offsets = [0, 2], sizes = [4, 128], strides = [1, 1]} : vector<4x256xf32> to vector<4x128xf32>
    %45 = tpu.concatenate %42, %43, %44 in 0 : vector<4x128xf32>, vector<4x128xf32>, vector<4x128xf32> -> vector<12x128xf32>
    %c0_19 = arith.constant 0 : index
    %c0_20 = arith.constant 0 : index
    %c0_21 = arith.constant 0 : index
    %46 = vector.load %arg4[%c0_19, %c0_20, %c0_21] : memref<3x4x12xf32, #tpu.memory_space<vmem>>, vector<1x4x12xf32>
    %47 = vector.shape_cast %46 : vector<1x4x12xf32> to vector<4x12xf32>
    %cst_22 = arith.constant dense<0.000000e+00> : vector<4x128xf32>
    %48 = tpu.matmul %47, %45, %cst_22 {dimension_numbers = #tpu.dot_dimension_numbers<[1], [0], [0], [1], [0, 0, 1, 1], [], []>} : vector<4x12xf32>, vector<12x128xf32>, vector<4x128xf32> -> vector<4x128xf32>
    %49 = vector.extract_strided_slice %41 {offsets = [0, 18], sizes = [4, 128], strides = [1, 1]} : vector<4x256xf32> to vector<4x128xf32>
    %50 = vector.extract_strided_slice %41 {offsets = [0, 19], sizes = [4, 128], strides = [1, 1]} : vector<4x256xf32> to vector<4x128xf32>
    %51 = vector.extract_strided_slice %41 {offsets = [0, 20], sizes = [4, 128], strides = [1, 1]} : vector<4x256xf32> to vector<4x128xf32>
    %52 = tpu.concatenate %49, %50, %51 in 0 : vector<4x128xf32>, vector<4x128xf32>, vector<4x128xf32> -> vector<12x128xf32>
    %c1_23 = arith.constant 1 : index
    %c0_24 = arith.constant 0 : index
    %c0_25 = arith.constant 0 : index
    %53 = vector.load %arg4[%c1_23, %c0_24, %c0_25] : memref<3x4x12xf32, #tpu.memory_space<vmem>>, vector<1x4x12xf32>
    %54 = vector.shape_cast %53 : vector<1x4x12xf32> to vector<4x12xf32>
    %cst_26 = arith.constant dense<0.000000e+00> : vector<4x128xf32>
    %55 = tpu.matmul %54, %52, %cst_26 {dimension_numbers = #tpu.dot_dimension_numbers<[1], [0], [0], [1], [0, 0, 1, 1], [], []>} : vector<4x12xf32>, vector<12x128xf32>, vector<4x128xf32> -> vector<4x128xf32>
    %56 = arith.addf %48, %55 : vector<4x128xf32>
    %57 = vector.extract_strided_slice %41 {offsets = [0, 36], sizes = [4, 128], strides = [1, 1]} : vector<4x256xf32> to vector<4x128xf32>
    %58 = vector.extract_strided_slice %41 {offsets = [0, 37], sizes = [4, 128], strides = [1, 1]} : vector<4x256xf32> to vector<4x128xf32>
    %59 = vector.extract_strided_slice %41 {offsets = [0, 38], sizes = [4, 128], strides = [1, 1]} : vector<4x256xf32> to vector<4x128xf32>
    %60 = tpu.concatenate %57, %58, %59 in 0 : vector<4x128xf32>, vector<4x128xf32>, vector<4x128xf32> -> vector<12x128xf32>
    %c2_27 = arith.constant 2 : index
    %c0_28 = arith.constant 0 : index
    %c0_29 = arith.constant 0 : index
    %61 = vector.load %arg4[%c2_27, %c0_28, %c0_29] : memref<3x4x12xf32, #tpu.memory_space<vmem>>, vector<1x4x12xf32>
    %62 = vector.shape_cast %61 : vector<1x4x12xf32> to vector<4x12xf32>
    %cst_30 = arith.constant dense<0.000000e+00> : vector<4x128xf32>
    %63 = tpu.matmul %62, %60, %cst_30 {dimension_numbers = #tpu.dot_dimension_numbers<[1], [0], [0], [1], [0, 0, 1, 1], [], []>} : vector<4x12xf32>, vector<12x128xf32>, vector<4x128xf32> -> vector<4x128xf32>
    %64 = arith.addf %56, %63 : vector<4x128xf32>
    %65 = vector.extract_strided_slice %4 {offsets = [0, 38], sizes = [4, 128], strides = [1, 1]} : vector<4x384xf32> to vector<4x128xf32>
    %66 = vector.broadcast %9 : vector<4x1xf32> to vector<4x128xf32>
    %67 = arith.mulf %64, %66 : vector<4x128xf32>
    %68 = vector.broadcast %10 : vector<4x1xf32> to vector<4x128xf32>
    %69 = arith.addf %67, %68 : vector<4x128xf32>
    %70 = arith.addf %69, %65 : vector<4x128xf32>
    %cst_31 = arith.constant 0.000000e+00 : f32
    %71 = vector.broadcast %cst_31 : f32 to vector<4x128xf32>
    %72 = arith.maximumf %70, %71 : vector<4x128xf32>
    %c0_32 = arith.constant 0 : index
    %c0_33 = arith.constant 0 : index
    %c0_34 = arith.constant 0 : index
    %73 = vector.load %arg7[%c0_32, %c0_33, %c0_34] : memref<1x4x128xf32, #tpu.memory_space<vmem>>, vector<1x4x128xf32>
    %74 = vector.shape_cast %73 : vector<1x4x128xf32> to vector<4x128xf32>
    %75 = vector.shape_cast %72 : vector<4x128xf32> to vector<1x4x128xf32>
    tpu.vector_store %arg7[%c0_32, %c0_33, %c0_34], %75 {strides = array<i32>} : memref<1x4x128xf32, #tpu.memory_space<vmem>>, vector<1x4x128xf32>,
    return
  }
  func.func @transform_0(%arg0: i32, %arg1: i32) -> (i32, i32, i32) {
    %c0_i32 = arith.constant 0 : i32
    %c0_i32_0 = arith.constant 0 : i32
    %c0_i32_1 = arith.constant 0 : i32
    return %arg0, %c0_i32, %c0_i32_0 : i32, i32, i32
  }
  func.func @transform_1(%arg0: i32, %arg1: i32) -> (i32, i32, i32) {
    %c0_i32 = arith.constant 0 : i32
    %c0_i32_0 = arith.constant 0 : i32
    %c0_i32_1 = arith.constant 0 : i32
    %c0_i32_2 = arith.constant 0 : i32
    return %c0_i32, %c0_i32_0, %c0_i32_1 : i32, i32, i32
  }
  func.func @transform_2(%arg0: i32, %arg1: i32) -> (i32, i32, i32) {
    %c0_i32 = arith.constant 0 : i32
    %c0_i32_0 = arith.constant 0 : i32
    %c0_i32_1 = arith.constant 0 : i32
    %c0_i32_2 = arith.constant 0 : i32
    return %c0_i32, %c0_i32_0, %c0_i32_1 : i32, i32, i32
  }
  func.func @transform_3(%arg0: i32, %arg1: i32) -> (i32, i32) {
    %c0_i32 = arith.constant 0 : i32
    %c0_i32_0 = arith.constant 0 : i32
    %c0_i32_1 = arith.constant 0 : i32
    return %c0_i32, %c0_i32_0 : i32, i32
  }
  func.func @transform_4(%arg0: i32, %arg1: i32) -> (i32, i32) {
    %c0_i32 = arith.constant 0 : i32
    %c0_i32_0 = arith.constant 0 : i32
    %c0_i32_1 = arith.constant 0 : i32
    return %c0_i32, %c0_i32_0 : i32, i32
  }
  func.func @transform_5(%arg0: i32, %arg1: i32) -> (i32, i32, i32) {
    %c0_i32 = arith.constant 0 : i32
    %c0_i32_0 = arith.constant 0 : i32
    return %arg0, %c0_i32, %arg1 : i32, i32, i32
  }
}

</mosaic_0001>

<bundles_post_ra>
// kernel: basic_block.1
= control target key start
LH: loop header
LB: loop body
LE: loop exit
PB: predicated region body
PF: predicated region fallthrough
CT: control target
= control target key end

     0   :  { %s1286_s18 = smov 0   ;;  %s1288_s19 = smov 0   ;;  %s1476_s0 = inlined_call_operand.vmem [shape: f32[2,4,640], index: 0, kind: input, shape index: {}]   ;;  %s1477_s1 = inlined_call_operand.vmem [shape: f32[3,4,12], index: 1, kind: input, shape index: {}]   ;;  %s1478_s2 = inlined_call_operand.vmem [shape: f32[3,4,12], index: 2, kind: input, shape index: {}]   ;;  %s1479_s3 = inlined_call_operand.vmem [shape: f32[4,4], index: 3, kind: input, shape index: {}]   ;;  %s1480_s4 = inlined_call_operand.vmem [shape: f32[1,512], index: 4, kind: input, shape index: {}]   ;;  %s1481_s5 = inlined_call_operand.vmem [shape: f32[2,4,384], index: 5, kind: output, shape index: {}]  }
   0x1   :  { %s1290_s20 = smov 0   ;;  %s1292_s21 = smov 0  }
   0x2   :  { %s1294_s22 = smov 0  }
   0x3 LB: > { %s24_s23 = sadd.s32 1, %s1233_s20  ;;  %s27_s24 = sadd.s32 1, %s1237_s21  ;;  %s1241_s22 = sphi %s1294_s22, %s15_s22   ;;  %s1237_s21 = sphi %s1292_s21, %s1487_s21   ;;  %s1233_s20 = sphi %s1290_s20, %s1486_s20   ;;  %s1229_s19 = sphi %s1288_s19, %s1485_s19   ;;  %s1225_s18 = sphi %s1286_s18, %s1484_s18  }
   0x4   : > { %p25_p0 = scmp.ge.s32.totalorder %s24_s23, 3  ;;  %p977_p1 = scmp.ge.s32.totalorder %s1241_s22, 1 }
   0x5   : > { %p201_p2 = scmp.lt.s32.totalorder %s1241_s22, 7 }
   0x6   : > { %s1489_s23 = smov (%p25_p0, %s24_s23), 0  ;;  %s1491_s24 = smov (!%p25_p0, %s27_s24), %s1237_s21 }
   0x7   : > { %p202_p3 = pnand %p977_p1, %p201_p2  ;;  %p29_p4 = scmp.ge.s32.totalorder %s1491_s24, 2 }
   0x8   : > { %p232_p5 = scmp.lt.s32.totalorder (!%p202_p3), %s1229_s19, 1  ;;  %s980_s25 = sshll.u32 (!%p202_p3), %s1225_s18, 7  ;;  %vm267_vm0 = vcmask (!%p202_p3), 1039360   ;;  %vm281_vm1 = vcmask (!%p202_p3), 1043456   ;;  %vm278_vm2 = vcmask (!%p202_p3), 1031168   ;;  %v1246_v26 = vmov (!%p202_p3), 0.0  }
   0x9   : > { %s1493_s24 = smov (%p29_p4, %s1491_s24), 0  ;;  %205 = sbr.rel (%p202_p3) target bundleno = 996 (0x3e4), region = 40 }
   0xa   : > { %s1319_s26 = sshra.s32 (!%p202_p3), %s980_s25, 7  ;;  %s1243_s8 = smov (!%p202_p3), 127   ;;  %383 = vmatprep.mubr.f32.mxu0 (!%p202_p3), %v1246_v26  ;;  %v1366_v28 = vld [vmem:[%s1479_s3] sm:$0xf] (!%p202_p3)  ;;  %v1248_v29 = vmov (!%p202_p3), 0   ;;  %v1249_v30 = vmov (!%p202_p3), 1  }
   0xb   : > { %s981_s28 = sshll.u32 (!%p202_p3), %s1319_s26, 2  ;;  %s1244_s9 = smov (!%p202_p3), 126   ;;  %1166 = vset.pattern.permute.xlu0 (!%p202_p3), %v1248_v29  ;;  %1167 = vset.pattern.permute.xlu1 (!%p202_p3), %v1249_v30  ;;  %vm304_vm3 = vcmask (!%p202_p3), 900096   ;;  %vm1250_vm4 = vmmov (!%p202_p3), 1   ;;  %vm482_vm6 = vcmask (!%p202_p3), 752640   ;;  %vm311_vm7 = vcmask (!%p202_p3), 97280  }
   0xc   : > { %s1245_s10 = smov (!%p202_p3), 110   ;;  %s1247_s11 = smov (!%p202_p3), 92   ;;  %vm1373_vm5 = vmpackc.low (!%p202_p3), %vm281_vm1, %vm1250_vm4  ;;  %v982_v54 = vld [vmem:[%s1477_s1 + $0x4] sm:$0xf] (!%p202_p3)  ;;  %v284_v62 = vld [vmem:[%s1477_s1] sm:$0xf] (!%p202_p3) }
   0xd   : > { %s252_s30 = scalar_lea.vmem (!%p202_p3), %s1480_s4, %s1319_s26  ;;  %vm1252_vm8 = vmmov (!%p202_p3), 0   ;;  %s1255_s26 = smov (!%p202_p3), 90   ;;  %vm884_vm9 = vcmask (!%p202_p3), 736256  }
   0xe   : > { %1016 = vmatprep.mubr.msk.f32.mxu1 (!%p202_p3), %vm1252_vm8, %v1246_v26  ;;  %p239_p6 = scmp.lt.s32.totalorder (!%p202_p3), %s1225_s18, 2 }
  0x10   : > { %s1495_s19 = smov (!%p232_p5, %s1229_s19), 1  ;;  %s1497_s18 = smov (!%p239_p6, %s1225_s18), 2 }
  0x11   : > { %s1071_s27 = smul.u32 20, %s1495_s19 }
  0x12   : > { %s1072_s12 = smul.u32 3, %s1495_s19 }
  0x13   : > { %s236_s6 = scalar_lea.vmem %s1476_s0, %s1071_s27 }
  0x14   : > { %s249_s7 = scalar_lea.vmem %s236_s6, %s981_s28  ;;  %s242_s13 = sadd.s32 %s1072_s12, %s1497_s18 }
  0x15   : > { %v1328_v0 = vld [vmem:[%s249_s7] sm:$0xff]  ;;  %v251_v1 = vld [vmem:[%s249_s7 + $0x8] sm:$0xf]  ;;  %s979_s14 = sshll.u32 %s242_s13, 2 }
  0x16   : > { %v260_v2 = vcombine.low %v251_v1, %v251_v1  ;;  %v1332_v3 = vcombine.high %v1328_v0, %v1328_v0  ;;  %v259_v6 = vcombine.low %v1328_v0, %v1328_v0  ;;  %s244_s17 = scalar_lea.vmem %s1481_s5, %s979_s14 }
  0x18   : > { %v1126_v4 = vpack.i.bf16 %v260_v2, %v1328_v0  ;;  %v1131_v5 = vpack.i.bf16 %v251_v1, %v1332_v3  ;;  %v585_v2 = vlaneseq }
  0x1a   : > { %1127 = vrot.lane.b32.xlu0 %v1126_v4, %s1243_s8  ;;  %1132 = vrot.lane.b32.xlu1 %v1131_v5, %s1244_s9  ;;  %v586_v4 = vshrl.u32 %v585_v2, 7 }
  0x1e   : > { %261 = vrot.lane.b32.xlu0 %v259_v6, %s1243_s8  ;;  %272 = vrot.lane.b32.xlu1 %v1328_v0, %s1244_s9  ;;  %v587_v6 = vsub.s32 0, %v586_v4 }
  0x8c   : > { %v1128_v7 = vpop.permute.xlu0 %1127  ;;  %v1133_v8 = vpop.permute.xlu1 %1132 }
  0x8d   : > { %v1130_v9 = vunpack.i.h.bf16 %v1128_v7  ;;  %v1129_v10 = vunpack.i.l.bf16 %v1128_v7  ;;  %v1135_v11 = vunpack.i.h.bf16 %v1133_v8  ;;  %v1134_v12 = vunpack.i.l.bf16 %v1133_v8  ;;  %v253_v8 = vld [vmem:[%s252_s30] sm:$0x3] }
  0x8f   : > { %v269_v13 = vsel %vm267_vm0, %v1129_v10, %v1130_v9  ;;  %v1345_v14 = vsel %vm278_vm2, %v1134_v12, %v1135_v11  ;;  %v286_v15 = vsel %vm281_vm1, %v251_v1, %v1130_v9  ;;  %v989_v1 = vld [vmem:[%s1477_s1 + $0x8] sm:$0xf]  ;;  %v591_v9 = vsub.s32 1, %v586_v4 }
  0x90   : > { %v262_v16 = vpop.permute.xlu0 %261  ;;  %v273_v17 = vpop.permute.xlu1 %272  ;;  %v1136_v18 = vpack.i.bf16 %v1135_v11, %v1345_v14  ;;  %v283_v19 = vsel %vm281_vm1, %v1332_v3, %v269_v13 }
  0x91   : > { %v268_v20 = vsel %vm267_vm0, %v262_v16, %v1129_v10  ;;  %v279_v21 = vsel %vm278_vm2, %v273_v17, %v1134_v12  ;;  %v1141_v22 = vpack.i.bf16 %v286_v15, %v283_v19  ;;  %v1039_v24 = vpack.c.bf16 %v1345_v14, %v283_v19 }
  0x92   : > { %v282_v23 = vsel %vm281_vm1, %v1328_v0, %v268_v20  ;;  %1137 = vrot.lane.b32.xlu1 %v1136_v18, %s1245_s10  ;;  %v588_v14 = vrot.slane %v253_v8, %v587_v6  ;;  %v592_v16 = vrot.slane %v253_v8, %v591_v9 }
  0x93   : > { %v1042_v25 = vpack.c.bf16 %v279_v21, %v282_v23  ;;  %1142 = vrot.lane.b32.xlu0 %v1141_v22, %s1245_s10  ;;  %v1146_v27 = vpack.i.bf16 %v279_v21, %v282_v23 }
  0x96   : > { %1157 = vrot.lane.b32.xlu1 %v1141_v22, %s1247_s11 }
  0x97   : > { %1147 = vrot.lane.b32.xlu0 %v1146_v27, %s1245_s10 }
  0x9a   : > { %1162 = vrot.lane.b32.xlu1 %v1146_v27, %s1247_s11 }
  0x9b   : > { %1152 = vrot.lane.b32.xlu0 %v1136_v18, %s1247_s11 }
  0x9e   : > { %577 = vperm.xlu1 %1167, %v1366_v28  }
  0x9f   : > { %571 = vperm.xlu0 %1166, %v1366_v28  }
 0x104   : > { %v1138_v31 = vpop.permute.xlu1 %1137 }
 0x105   : > { %v1140_v32 = vunpack.i.h.bf16 %v1138_v31  ;;  %v1139_v33 = vunpack.i.l.bf16 %v1138_v31  ;;  %v1143_v34 = vpop.permute.xlu0 %1142  ;;  %v1251_v31 = vmov 0.0|0.0  }
 0x106   : > { %v1145_v35 = vunpack.i.h.bf16 %v1143_v34  ;;  %v1144_v36 = vunpack.i.l.bf16 %v1143_v34  ;;  %1051 = vmatprep.subr.bf16.mxu1 %v1251_v31 }
 0x107   : > { %v308_v37 = vsel %vm304_vm3, %v1139_v33, %v1140_v32 }
 0x108   : > { %v306_v38 = vsel %vm304_vm3, %v1144_v36, %v1145_v35  ;;  %v1158_v40 = vpop.permute.xlu1 %1157 }
 0x109   : > { %v1148_v41 = vpop.permute.xlu0 %1147  ;;  %v1033_v42 = vpack.c.bf16 %v308_v37, %v306_v38  ;;  %v1160_v45 = vunpack.i.h.bf16 %v1158_v40  ;;  %v1159_v46 = vunpack.i.l.bf16 %v1158_v40 }
 0x10a   : > { %v1150_v43 = vunpack.i.h.bf16 %v1148_v41  ;;  %v1149_v44 = vunpack.i.l.bf16 %v1148_v41 }
 0x10b   : > { %1035 = vmatprep.subr.msk.bf16.mxu0 %vm1373_vm5, %v1033_v42  ;;  %v484_v55 = vsel %vm482_vm6, %v1159_v46, %v1160_v45 }
 0x10c   : > { %v305_v47 = vsel %vm304_vm3, %v1149_v44, %v1144_v36  ;;  %v307_v48 = vsel %vm304_vm3, %v1150_v43, %v1139_v33  ;;  %v1163_v53 = vpop.permute.xlu1 %1162  ;;  %v1253_v43 = vmov 2   ;;  %v1254_v44 = vmov 3  }
 0x10d   : > { %v1153_v49 = vpop.permute.xlu0 %1152  ;;  %v1036_v50 = vpack.c.bf16 %v307_v48, %v305_v47  ;;  %v1165_v58 = vunpack.i.h.bf16 %v1163_v53  ;;  %v1164_v59 = vunpack.i.l.bf16 %v1163_v53  ;;  %1198 = vset.pattern.permute.xlu1 %v1253_v43  ;;  %1199 = vset.pattern.permute.xlu0 %v1254_v44 }
 0x10e   : > { %v1155_v51 = vunpack.i.h.bf16 %v1153_v49  ;;  %v1154_v52 = vunpack.i.l.bf16 %v1153_v49 }
 0x10f   : > { %1038 = vmatpush1.bf16.msk.msra.mxu0 %vm1373_vm5, %v1036_v50  ;;  %v483_v60 = vsel %vm482_vm6, %v1164_v59, %v1159_v46  ;;  %v613_v59 = vld [vmem:[%s1478_s2] sm:$0xf] }
 0x110   : > { %v486_v56 = vsel %vm482_vm6, %v1154_v52, %v1155_v51  ;;  %1041 = vmatprep.subr.msk.bf16.mxu0 %vm1373_vm5, %v1039_v24  ;;  %v485_v61 = vsel %vm482_vm6, %v1165_v58, %v1154_v52 }
 0x111   : > { %v1045_v57 = vpack.c.bf16 %v486_v56, %v484_v55  ;;  %v1048_v63 = vpack.c.bf16 %v485_v61, %v483_v60 }
 0x112   : > { %985 = vmatmul.mubr.msk.f32.vlgmr.msra.gmra.mrb[0].mxu0 %vm311_vm7, %v982_v54 }
 0x113   : > { %1044 = vmatpush1.bf16.msk.msra.mxu0 %vm1373_vm5, %v1042_v25  ;;  %461 = vmatprep.mubr.f32.mxu0 %v1246_v26 }
 0x114   : > { %1047 = vmatprep.subr.msk.bf16.mxu0 %vm1373_vm5, %v1045_v57 }
 0x11a   : > { %988 = vmatmul.mubr.msk.f32.vlgmr.msra.gmra.mrb[0].mxu0 %vm311_vm7, %v284_v62  ;;  %v998_v62 = vld [vmem:[%s1478_s2 + $0x8] sm:$0xf] }
 0x11b   : > { %1050 = vmatpush1.bf16.msk.msra.mxu0 %vm1373_vm5, %v1048_v63  ;;  %560 = vmatprep.mubr.f32.mxu0 %v1246_v26 }
 0x11d   : > { %v578_v10 = vpop.permute.xlu1 %577 }
 0x11e   : > { %v572_v5 = vpop.permute.xlu0 %571 }
 0x122   : > { %992 = vmatmul.mubr.msk.f32.vlgmr.msra.gmra.mrb[0].mxu0 %vm311_vm7, %v989_v1 }
 0x1f5   : > { %v562_v7 = vpop.f32.mrb[0].mxu0 }
 0x1f6   : > { %v574_v11 = vmul.f32 %v572_v5, %v562_v7  ;;  %v564_v12 = vpop.f32.mrb[1].mxu0 }
 0x1f7   : > { %v575_v13 = vmul.f32 %v572_v5, %v564_v12 }
 0x1f8   : > { %v580_v15 = vadd.f32 %v578_v10, %v574_v11 }
 0x1f9   : > { %v581_v17 = vadd.f32 %v578_v10, %v575_v13 }
 0x1fa   : > { %v582_v18 = vmax.f32 %v580_v15, 0.0 }
 0x1fb   : > { %v583_v19 = vmax.f32 %v581_v17, 0.0 }
 0x1fc   : > { %v595_v20 = vmul.f32 %v588_v14, %v582_v18 }
 0x1fd   : > { %v596_v21 = vmul.f32 %v592_v16, %v583_v19 }
 0x1fe   : > { %v599_v22 = vrot.slane %v595_v20, 4 }
 0x1ff   : > { %v1173_v23 = vpack.i.bf16 %v596_v21, %v595_v20  ;;  %v600_v24 = vrot.slane %v596_v21, 4 }
 0x201   : > { %1174 = vrot.lane.b32.xlu0 %v1173_v23, %s1244_s9  ;;  %v1168_v25 = vpack.i.bf16 %v600_v24, %v599_v22 }
 0x203   : > { %1169 = vrot.lane.b32.xlu1 %v1168_v25, %s1243_s8 }
 0x273   : > { %v1175_v27 = vpop.permute.xlu0 %1174 }
 0x274   : > { %v1177_v29 = vunpack.i.h.bf16 %v1175_v27  ;;  %v1176_v30 = vunpack.i.l.bf16 %v1175_v27 }
 0x275   : > { %v1170_v32 = vpop.permute.xlu1 %1169 }
 0x276   : > { %v1172_v33 = vunpack.i.h.bf16 %v1170_v32  ;;  %v1171_v34 = vunpack.i.l.bf16 %v1170_v32  ;;  %v611_v35 = vsel %vm278_vm2, %v1176_v30, %v1177_v29 }
 0x277   : > { %v1183_v36 = vpack.i.bf16 %v1177_v29, %v611_v35 }
 0x278   : > { %v605_v37 = vsel %vm267_vm0, %v1171_v34, %v1172_v33  ;;  %v615_v38 = vsel %vm281_vm1, %v596_v21, %v1172_v33 }
 0x279   : > { %1184 = vrot.lane.b32.xlu0 %v1183_v36, %s1245_s10  ;;  %v612_v40 = vsel %vm281_vm1, %v595_v20, %v605_v37 }
 0x27a   : > { %v1178_v41 = vpack.i.bf16 %v615_v38, %v612_v40  ;;  %v1056_v42 = vpack.c.bf16 %v611_v35, %v612_v40 }
 0x27c   : > { %1179 = vrot.lane.b32.xlu1 %v1178_v41, %s1245_s10 }
 0x27d   : > { %1194 = vrot.lane.b32.xlu0 %v1183_v36, %s1247_s11 }
 0x280   : > { %1189 = vrot.lane.b32.xlu1 %v1178_v41, %s1247_s11 }
 0x281   : > { %876 = vperm.xlu0 %1199, %v1366_v28  }
 0x284   : > { %871 = vperm.xlu1 %1198, %v1366_v28  }
 0x288   : > { %880 = vrot.lane.b32.xlu1 %v1328_v0, %s1255_s26  ;;  %v993_v0 = vld [vmem:[%s1478_s2 + $0x4] sm:$0xf] }
 0x28c   : > { %882 = vrot.lane.b32.xlu1 %v1332_v3, %s1255_s26 }
 0x2eb   : > { %v1185_v45 = vpop.permute.xlu0 %1184 }
 0x2ec   : > { %v1187_v46 = vunpack.i.h.bf16 %v1185_v45  ;;  %v1186_v47 = vunpack.i.l.bf16 %v1185_v45 }
 0x2ee   : > { %v1180_v48 = vpop.permute.xlu1 %1179  ;;  %v629_v52 = vsel %vm304_vm3, %v1186_v47, %v1187_v46 }
 0x2ef   : > { %v1182_v49 = vunpack.i.h.bf16 %v1180_v48  ;;  %v1181_v50 = vunpack.i.l.bf16 %v1180_v48  ;;  %v1195_v3 = vpop.permute.xlu0 %1194 }
 0x2f0   : > { %v1197_v56 = vunpack.i.h.bf16 %v1195_v3  ;;  %v1196_v57 = vunpack.i.l.bf16 %v1195_v3 }
 0x2f1   : > { %v628_v51 = vsel %vm304_vm3, %v1181_v50, %v1182_v49 }
 0x2f2   : > { %v1052_v53 = vpack.c.bf16 %v629_v52, %v628_v51  ;;  %v1190_v54 = vpop.permute.xlu1 %1189  ;;  %v792_v60 = vsel %vm482_vm6, %v1196_v57, %v1197_v56 }
 0x2f3   : > { %v1192_v28 = vunpack.i.h.bf16 %v1190_v54  ;;  %v1191_v55 = vunpack.i.l.bf16 %v1190_v54 }
 0x2f4   : > { %1054 = vmatpush3.bf16.msk.msra.mxu1 %vm1373_vm5, %v1052_v53 }
 0x2f5   : > { %1055 = vmatprep.subr.bf16.mxu1 %v1251_v31  ;;  %v791_v58 = vsel %vm482_vm6, %v1191_v55, %v1192_v28 }
 0x2f6   : > { %v1060_v61 = vpack.c.bf16 %v792_v60, %v791_v58 }
 0x2f7   : > { %1017 = vmatmul.mubr.msk.f32.vlgmr.msra.gmra.mrb[0].mxu1 %vm311_vm7, %v993_v0 }
 0x2f8   : > { %1058 = vmatpush3.bf16.msk.msra.mxu1 %vm1373_vm5, %v1056_v42  ;;  %1023 = vmatprep.mubr.msk.f32.mxu1 %vm1252_vm8, %v1246_v26 }
 0x2f9   : > { %1059 = vmatprep.subr.bf16.mxu1 %v1251_v31 }
 0x2ff   : > { %1024 = vmatmul.mubr.msk.f32.vlgmr.msra.gmra.mrb[0].mxu1 %vm311_vm7, %v613_v59 }
 0x300   : > { %1062 = vmatpush3.bf16.msk.msra.mxu1 %vm1373_vm5, %v1060_v61  ;;  %1030 = vmatprep.mubr.msk.f32.mxu1 %vm1252_vm8, %v1246_v26  ;;  %v877_v4 = vpop.permute.xlu0 %876 }
 0x303   : > { %v872_v63 = vpop.permute.xlu1 %871 }
 0x307   : > { %1031 = vmatmul.mubr.msk.f32.vlgmr.msra.gmra.mrb[0].mxu1 %vm311_vm7, %v998_v62  ;;  %v881_v1 = vpop.permute.xlu1 %880 }
 0x30b   : > { %v883_v39 = vpop.permute.xlu1 %882 }
 0x30c   : > { %v885_v7 = vsel %vm884_vm9, %v881_v1, %v883_v39 }
 0x3da   : > { %v865_v2 = vpop.f32.mrb[0].mxu1 }
 0x3db   : > { %v874_v5 = vmul.f32 %v872_v63, %v865_v2  ;;  %v1032_v6 = vpop.f32.mrb[1].mxu1 }
 0x3dd   : > { %v879_v26 = vadd.f32 %v877_v4, %v874_v5 }
 0x3df   : > { %v887_v8 = vadd.f32 %v885_v7, %v879_v26 }
 0x3e1   : > { %v888_v9 = vmax.f32 %v887_v8, 0.0 }
 0x3e3   : > { %889 = vst [vmem:[%s244_s17] sm:$0xf] %v888_v9 }
 0x3e4 PF: > { %s15_s22 = sadd.s32 1, %s1241_s22   ;;  %s1484_s18 = smov %s1233_s20 }
 0x3e5   : > { %p12_p7 = scmp.ge.s32.totalorder %s15_s22, 8   ;;  %s1485_s19 = smov %s1237_s21 }
 0x3e6   : > { %s1486_s20 = smov %s1489_s23  ;;  %s1487_s21 = smov %s1493_s24 }
 0x3e7   :  { %14 = sbr.rel (!%p12_p7) target bundleno = 3 (0x3), region = 76 }

</bundles_post_ra>
